<compile_context>
chip_gen: v6e
topology: v6e:2x2x1
jax: 0.10.0
libtpu: 0.0.40
codegen_flags: <defaults>
</compile_context>

<pallas_src>
import jax
import jax.numpy as jnp
from jax.experimental import pallas as pl
from jax.experimental.pallas import tpu as pltpu

LATENT_DIMS = 2
HIDDEN = 512
OUT = 784  # 28 * 28


def _round_up(x, m):
    return ((x + m - 1) // m) * m


def _decoder_kernel(z_ref, w1_ref, b1_ref, w2_ref, b2_ref, o_ref):
    z = z_ref[...]                                   # (TB, 2) f32
    # ---- layer 1 on the VPU (K=2 would be >98% MXU padding) ----
    h = (z[:, 0:1] * w1_ref[0:1, :]
         + z[:, 1:2] * w1_ref[1:2, :]
         + b1_ref[...])                              # (TB, 512) f32
    h = jnp.maximum(h, 0.0)
    # ---- layer 2 on the MXU, bf16 operands, f32 accumulate ----
    y = jnp.dot(h.astype(jnp.bfloat16), w2_ref[...],
                preferred_element_type=jnp.float32)  # (TB, 784) f32
    y = y + b2_ref[...]
    # sigmoid(y) == 0.5 * (tanh(0.5*y) + 1): single EUP push, overflow-free.
    o_ref[...] = 0.5 * (jnp.tanh(0.5 * y) + 1.0)


def prepare_params(w1, b1, w2, b2):
    """Cast once at load time; forward consumes the already-bf16 w2."""
    return (w1.astype(jnp.float32),
            b1.astype(jnp.float32).reshape(1, HIDDEN),
            w2.astype(jnp.bfloat16),
            b2.astype(jnp.float32).reshape(1, OUT))


def decoder_forward(z, params, *, tb=1024):
    """z: (B, latent_dims) f32, params from prepare_params -> (B, 1, 28, 28) f32."""
    w1, b1, w2_bf16, b2 = params
    B = z.shape[0]

    # Batch tile: multiple of 8 (sublane), capped at `tb`, and split into at
    # least 2 grid steps when possible so v7x's second TensorCore gets work.
    tile = min(tb, max(8, _round_up(pl.cdiv(B, 2), 8)))
    b_pad = _round_up(B, tile)
    if b_pad != B:
        z = jnp.pad(z, ((0, b_pad - B), (0, 0)))

    cost = pl.CostEstimate(
        flops=2 * b_pad * HIDDEN * OUT + 4 * b_pad * HIDDEN,
        transcendentals=b_pad * OUT,
        bytes_accessed=(b_pad * LATENT_DIMS * 4     # z
                        + HIDDEN * OUT * 2          # w2 bf16
                        + LATENT_DIMS * HIDDEN * 4  # w1
                        + HIDDEN * 4 + OUT * 4      # biases
                        + b_pad * OUT * 4),         # output
    )

    out = pl.pallas_call(
        _decoder_kernel,
        out_shape=jax.ShapeDtypeStruct((b_pad, OUT), jnp.float32),
        grid=(b_pad // tile,),
        in_specs=[
            pl.BlockSpec((tile, LATENT_DIMS), lambda i: (i, 0)),
            pl.BlockSpec((LATENT_DIMS, HIDDEN), lambda i: (0, 0)),
            pl.BlockSpec((1, HIDDEN), lambda i: (0, 0)),
            pl.BlockSpec((HIDDEN, OUT), lambda i: (0, 0)),
            pl.BlockSpec((1, OUT), lambda i: (0, 0)),
        ],
        out_specs=pl.BlockSpec((tile, OUT), lambda i: (i, 0)),
        compiler_params=pltpu.CompilerParams(
            dimension_semantics=("parallel",),
            vmem_limit_bytes=32 << 20,
        ),
        cost_estimate=cost,
    )(z, w1, b1, w2_bf16, b2)
    return out[:B].reshape((-1, 1, 28, 28))


def _init_linear(key, fan_in, fan_out):
    # Matches PyTorch nn.Linear default: U(-1/sqrt(fan_in), +1/sqrt(fan_in)).
    kw, kb = jax.random.split(key)
    bound = 1.0 / (fan_in ** 0.5)
    w = jax.random.uniform(kw, (fan_in, fan_out), jnp.float32, -bound, bound)
    b = jax.random.uniform(kb, (1, fan_out), jnp.float32, -bound, bound)
    return w, b


def _reference(z, w1, b1, w2, b2):
    # Mirrors the kernel's numerics: f32 layer 1, bf16-operand layer 2.
    # Note: intentionally deviates from the pure-f32 PyTorch decoder (layer-2
    # operands rounded to bf16); sigmoid itself is exact (tanh form).
    h = jnp.maximum(z @ w1 + b1, 0.0)
    h_bf = h.astype(jnp.bfloat16).astype(jnp.float32)
    w2_bf = w2.astype(jnp.bfloat16).astype(jnp.float32)
    y = jax.nn.sigmoid(h_bf @ w2_bf + b2)
    return y.reshape((-1, 1, 28, 28))


if __name__ == "__main__":
    key = jax.random.PRNGKey(0)
    kz, k1, k2 = jax.random.split(key, 3)

    w1, b1 = _init_linear(k1, LATENT_DIMS, HIDDEN)
    w2, b2 = _init_linear(k2, HIDDEN, OUT)
    params = prepare_params(w1, b1, w2, b2)   # one-time bf16 cast, cached

    # Small batches: B=8 single tile; B=12 exercises padding + 2-tile grid.
    for B in (8, 12):
        z = jax.random.normal(jax.random.fold_in(kz, B), (B, LATENT_DIMS),
                              jnp.float32)
        out = decoder_forward(z, params)
        out = jax.block_until_ready(out)

        ref = _reference(z, w1, b1, w2, b2)
        assert out.shape == (B, 1, 28, 28), out.shape
        assert jnp.allclose(out, ref, atol=1e-2, rtol=1e-2), (
            float(jnp.max(jnp.abs(out - ref))))

    print("KERNEL_OK")
</pallas_src>

<mosaic_0001>
module attributes {stable_mosaic.version = 11 : i64} {
  func.func @_decoder_kernel(%arg0: i32, %arg1: memref<8x2xf32, #tpu.memory_space<vmem>>, %arg2: memref<2x512xf32, #tpu.memory_space<vmem>>, %arg3: memref<1x512xf32, #tpu.memory_space<vmem>>, %arg4: memref<512x784xbf16, #tpu.memory_space<vmem>>, %arg5: memref<1x784xf32, #tpu.memory_space<vmem>>, %arg6: memref<8x784xf32, #tpu.memory_space<vmem>>) attributes {dimension_semantics = [#tpu.dimension_semantics<parallel>], iteration_bounds = array<i64: 1>, scalar_prefetch = 0 : i64, scratch_operands = 0 : i64, tpu.core_type = #tpu.core_type<tc>, window_params = [{transform_indices = @transform_0, window_bounds = array<i64: 8, 2>}, {pipeline_mode = #tpu.pipeline_mode<synchronous>, transform_indices = @transform_1, window_bounds = array<i64: 2, 512>}, {pipeline_mode = #tpu.pipeline_mode<synchronous>, transform_indices = @transform_2, window_bounds = array<i64: 1, 512>}, {pipeline_mode = #tpu.pipeline_mode<synchronous>, transform_indices = @transform_3, window_bounds = array<i64: 512, 784>}, {pipeline_mode = #tpu.pipeline_mode<synchronous>, transform_indices = @transform_4, window_bounds = array<i64: 1, 784>}, {transform_indices = @transform_5, window_bounds = array<i64: 8, 784>}]} {
    %c0 = arith.constant 0 : index
    %c0_0 = arith.constant 0 : index
    %0 = vector.load %arg1[%c0, %c0_0] : memref<8x2xf32, #tpu.memory_space<vmem>>, vector<8x2xf32>
    %1 = vector.extract_strided_slice %0 {offsets = [0, 0], sizes = [8, 1], strides = [1, 1]} : vector<8x2xf32> to vector<8x1xf32>
    %c0_1 = arith.constant 0 : index
    %c0_2 = arith.constant 0 : index
    %2 = vector.load %arg2[%c0_1, %c0_2] : memref<2x512xf32, #tpu.memory_space<vmem>>, vector<1x512xf32>
    %3 = vector.broadcast %1 : vector<8x1xf32> to vector<8x512xf32>
    %4 = vector.broadcast %2 : vector<1x512xf32> to vector<8x512xf32>
    %5 = arith.mulf %3, %4 : vector<8x512xf32>
    %6 = vector.extract_strided_slice %0 {offsets = [0, 1], sizes = [8, 1], strides = [1, 1]} : vector<8x2xf32> to vector<8x1xf32>
    %c1 = arith.constant 1 : index
    %c0_3 = arith.constant 0 : index
    %7 = vector.load %arg2[%c1, %c0_3] : memref<2x512xf32, #tpu.memory_space<vmem>>, vector<1x512xf32>
    %8 = vector.broadcast %6 : vector<8x1xf32> to vector<8x512xf32>
    %9 = vector.broadcast %7 : vector<1x512xf32> to vector<8x512xf32>
    %10 = arith.mulf %8, %9 : vector<8x512xf32>
    %11 = arith.addf %5, %10 : vector<8x512xf32>
    %c0_4 = arith.constant 0 : index
    %c0_5 = arith.constant 0 : index
    %12 = vector.load %arg3[%c0_4, %c0_5] : memref<1x512xf32, #tpu.memory_space<vmem>>, vector<1x512xf32>
    %13 = vector.broadcast %12 : vector<1x512xf32> to vector<8x512xf32>
    %14 = arith.addf %11, %13 : vector<8x512xf32>
    %cst = arith.constant 0.000000e+00 : f32
    %15 = vector.broadcast %cst : f32 to vector<8x512xf32>
    %16 = arith.maximumf %14, %15 : vector<8x512xf32>
    %17 = arith.truncf %16 : vector<8x512xf32> to vector<8x512xbf16>
    %c0_6 = arith.constant 0 : index
    %c0_7 = arith.constant 0 : index
    %18 = vector.load %arg4[%c0_6, %c0_7] : memref<512x784xbf16, #tpu.memory_space<vmem>>, vector<512x784xbf16>
    %cst_8 = arith.constant dense<0.000000e+00> : vector<8x784xf32>
    %19 = tpu.matmul %17, %18, %cst_8 {dimension_numbers = #tpu.dot_dimension_numbers<[1], [0], [0], [1], [0, 0, 1, 1], [], []>} : vector<8x512xbf16>, vector<512x784xbf16>, vector<8x784xf32> -> vector<8x784xf32>
    %c0_9 = arith.constant 0 : index
    %c0_10 = arith.constant 0 : index
    %20 = vector.load %arg5[%c0_9, %c0_10] : memref<1x784xf32, #tpu.memory_space<vmem>>, vector<1x784xf32>
    %21 = vector.broadcast %20 : vector<1x784xf32> to vector<8x784xf32>
    %22 = arith.addf %19, %21 : vector<8x784xf32>
    %cst_11 = arith.constant 5.000000e-01 : f32
    %23 = vector.broadcast %cst_11 : f32 to vector<8x784xf32>
    %24 = arith.mulf %23, %22 : vector<8x784xf32>
    %25 = math.tanh %24 : vector<8x784xf32>
    %cst_12 = arith.constant 1.000000e+00 : f32
    %26 = vector.broadcast %cst_12 : f32 to vector<8x784xf32>
    %27 = arith.addf %25, %26 : vector<8x784xf32>
    %cst_13 = arith.constant 5.000000e-01 : f32
    %28 = vector.broadcast %cst_13 : f32 to vector<8x784xf32>
    %29 = arith.mulf %28, %27 : vector<8x784xf32>
    %c0_14 = arith.constant 0 : index
    %c0_15 = arith.constant 0 : index
    %30 = vector.load %arg6[%c0_14, %c0_15] : memref<8x784xf32, #tpu.memory_space<vmem>>, vector<8x784xf32>
    tpu.vector_store %arg6[%c0_14, %c0_15], %29 {strides = array<i32>} : memref<8x784xf32, #tpu.memory_space<vmem>>, vector<8x784xf32>,
    return
  }
  func.func @transform_0(%arg0: i32) -> (i32, i32) {
    %c0_i32 = arith.constant 0 : i32
    %c0_i32_0 = arith.constant 0 : i32
    return %arg0, %c0_i32 : i32, i32
  }
  func.func @transform_1(%arg0: i32) -> (i32, i32) {
    %c0_i32 = arith.constant 0 : i32
    %c0_i32_0 = arith.constant 0 : i32
    %c0_i32_1 = arith.constant 0 : i32
    return %c0_i32, %c0_i32_0 : i32, i32
  }
  func.func @transform_2(%arg0: i32) -> (i32, i32) {
    %c0_i32 = arith.constant 0 : i32
    %c0_i32_0 = arith.constant 0 : i32
    %c0_i32_1 = arith.constant 0 : i32
    return %c0_i32, %c0_i32_0 : i32, i32
  }
  func.func @transform_3(%arg0: i32) -> (i32, i32) {
    %c0_i32 = arith.constant 0 : i32
    %c0_i32_0 = arith.constant 0 : i32
    %c0_i32_1 = arith.constant 0 : i32
    return %c0_i32, %c0_i32_0 : i32, i32
  }
  func.func @transform_4(%arg0: i32) -> (i32, i32) {
    %c0_i32 = arith.constant 0 : i32
    %c0_i32_0 = arith.constant 0 : i32
    %c0_i32_1 = arith.constant 0 : i32
    return %c0_i32, %c0_i32_0 : i32, i32
  }
  func.func @transform_5(%arg0: i32) -> (i32, i32) {
    %c0_i32 = arith.constant 0 : i32
    %c0_i32_0 = arith.constant 0 : i32
    return %arg0, %c0_i32 : i32, i32
  }
}

</mosaic_0001>

<bundles_post_ra>
// kernel: tpu_custom_call.1
= control target key start
LH: loop header
LB: loop body
LE: loop exit
PB: predicated region body
PF: predicated region fallthrough
CT: control target
= control target key end

     0   :  { %v2574_v1 = vmov 0   ;;  %v2575_v10 = vmov 1   ;;  %s3363_s0 = inlined_call_operand.vmem [shape: f32[8,2], index: 0, kind: input, shape index: {}]   ;;  %s3364_s1 = inlined_call_operand.vmem [shape: f32[2,512], index: 1, kind: input, shape index: {}]   ;;  %s3365_s2 = inlined_call_operand.vmem [shape: f32[1,512], index: 2, kind: input, shape index: {}]   ;;  %s3366_s3 = inlined_call_operand.vmem [shape: bf16[512,784], index: 3, kind: input, shape index: {}]   ;;  %s3367_s4 = inlined_call_operand.vmem [shape: f32[1,784], index: 4, kind: input, shape index: {}]   ;;  %s3368_s5 = inlined_call_operand.hbm [shape: f32[8,784], index: 5, kind: output, shape index: {}]  }
   0x1   :  { %v22_v0 = vld [vmem:[%s3363_s0] sm:$0xff]  ;;  %2216 = vset.pattern.permute.xlu0 %v2574_v1  ;;  %v2218_v2 = vld [vmem:[%s3366_s3 + $0x18c] ss:$28 sps:$4 sm:$0xff]   ;;  %v2224_v6 = vld [vmem:[%s3366_s3 + $0x154] ss:$28 sps:$4 sm:$0xff]  }
   0x2   :  { %26 = vperm.xlu0 %2216, %v22_v0   ;;  %v2220_v3 = vld [vmem:[%s3366_s3 + $0x50c] ss:$28 sps:$4 sm:$0xff]   ;;  %1568 = vmatprep.subr.bf16.mxu0 %v2218_v2  ;;  %v2226_v7 = vld [vmem:[%s3366_s3 + $0x4d4] ss:$28 sps:$4 sm:$0xff]   ;;  %v2230_v11 = vld [vmem:[%s3366_s3 + $0x11c] ss:$28 sps:$4 sm:$0xff]  }
   0x3   :  { %v2222_v4 = vld [vmem:[%s3366_s3 + $0x188] ss:$28 sps:$4 sm:$0xff]   ;;  %1609 = vmatprep.subr.bf16.mxu1 %v2220_v3  ;;  %v2228_v8 = vld [vmem:[%s3366_s3 + $0x150] ss:$28 sps:$4 sm:$0xff]   ;;  %v2232_v12 = vld [vmem:[%s3366_s3 + $0x49c] ss:$28 sps:$4 sm:$0xff]  }
   0x4   :  { %v2223_v5 = vld [vmem:[%s3366_s3 + $0x508] ss:$28 sps:$4 sm:$0xff]   ;;  %1569 = vmatpush1.bf16.msra.mxu0 %v2222_v4  ;;  %v2229_v9 = vld [vmem:[%s3366_s3 + $0x4d0] ss:$28 sps:$4 sm:$0xff]   ;;  %v2234_v13 = vld [vmem:[%s3366_s3 + $0x118] ss:$28 sps:$4 sm:$0xff]  }
   0x5   :  { %1610 = vmatpush1.bf16.msra.mxu1 %v2223_v5  ;;  %1570 = vmatprep.subr.bf16.mxu0 %v2224_v6  ;;  %v2235_v14 = vld [vmem:[%s3366_s3 + $0x498] ss:$28 sps:$4 sm:$0xff]   ;;  %v2236_v15 = vld [vmem:[%s3366_s3 + $0xe4] ss:$28 sps:$4 sm:$0xff]   ;;  %v2242_v19 = vld [vmem:[%s3366_s3 + $0xac] ss:$28 sps:$4 sm:$0xff]   ;;  %v30_v5 = vlaneseq }
   0x6   :  { %2217 = vset.pattern.permute.xlu0 %v2575_v10  ;;  %1611 = vmatprep.subr.bf16.mxu1 %v2226_v7  ;;  %v2238_v16 = vld [vmem:[%s3366_s3 + $0x464] ss:$28 sps:$4 sm:$0xff]   ;;  %v2244_v20 = vld [vmem:[%s3366_s3 + $0x42c] ss:$28 sps:$4 sm:$0xff]   ;;  %v2248_v23 = vld [vmem:[%s3366_s3 + $0x74] ss:$28 sps:$4 sm:$0xff]  }
   0x7   :  { %57 = vperm.xlu0 %2217, %v22_v0   ;;  %v2240_v17 = vld [vmem:[%s3366_s3 + $0xe0] ss:$28 sps:$4 sm:$0xff]   ;;  %v2246_v21 = vld [vmem:[%s3366_s3 + $0xa8] ss:$28 sps:$4 sm:$0xff]   ;;  %v2250_v24 = vld [vmem:[%s3366_s3 + $0x3f4] ss:$28 sps:$4 sm:$0xff]  }
   0x8   :  { %1571 = vmatpush1.bf16.msra.mxu0 %v2228_v8  ;;  %v2241_v18 = vld [vmem:[%s3366_s3 + $0x460] ss:$28 sps:$4 sm:$0xff]   ;;  %v2247_v22 = vld [vmem:[%s3366_s3 + $0x428] ss:$28 sps:$4 sm:$0xff]   ;;  %v2252_v25 = vld [vmem:[%s3366_s3 + $0x70] ss:$28 sps:$4 sm:$0xff]  }
   0x9   :  { %1612 = vmatpush1.bf16.msra.mxu1 %v2229_v9  ;;  %1572 = vmatprep.subr.bf16.mxu0 %v2230_v11  ;;  %v2253_v26 = vld [vmem:[%s3366_s3 + $0x3f0] ss:$28 sps:$4 sm:$0xff]   ;;  %v2254_v27 = vld [vmem:[%s3366_s3 + $0x3c] ss:$28 sps:$4 sm:$0xff]   ;;  %v2260_v31 = vld [vmem:[%s3366_s3 + $0x4] ss:$28 sps:$4 sm:$0xff]  }
   0xa   :  { %1613 = vmatprep.subr.bf16.mxu1 %v2232_v12  ;;  %v2256_v28 = vld [vmem:[%s3366_s3 + $0x3bc] ss:$28 sps:$4 sm:$0xff]   ;;  %v2262_v32 = vld [vmem:[%s3366_s3 + $0x384] ss:$28 sps:$4 sm:$0xff]   ;;  %v2266_v35 = vld [vmem:[%s3366_s3 + $0x34c] ss:$28 sps:$4 sm:$0xff]  }
   0xb   :  { %v2258_v29 = vld [vmem:[%s3366_s3 + $0x38] ss:$28 sps:$4 sm:$0xff]   ;;  %v2264_v33 = vld [vmem:[%s3366_s3] ss:$28 sps:$4 sm:$0xff]   ;;  %v2268_v36 = vld [vmem:[%s3366_s3 + $0x6cc] ss:$28 sps:$4 sm:$0xff]  }
   0xc   :  { %1573 = vmatpush1.bf16.msra.mxu0 %v2234_v13  ;;  %v2259_v30 = vld [vmem:[%s3366_s3 + $0x3b8] ss:$28 sps:$4 sm:$0xff]   ;;  %v2265_v34 = vld [vmem:[%s3366_s3 + $0x380] ss:$28 sps:$4 sm:$0xff]   ;;  %v2270_v37 = vld [vmem:[%s3366_s3 + $0x348] ss:$28 sps:$4 sm:$0xff]  }
   0xd   :  { %1614 = vmatpush1.bf16.msra.mxu1 %v2235_v14  ;;  %1574 = vmatprep.subr.bf16.mxu0 %v2236_v15  ;;  %v2271_v38 = vld [vmem:[%s3366_s3 + $0x6c8] ss:$28 sps:$4 sm:$0xff]   ;;  %v2272_v39 = vld [vmem:[%s3366_s3 + $0x314] ss:$28 sps:$4 sm:$0xff]   ;;  %v2278_v43 = vld [vmem:[%s3366_s3 + $0x2dc] ss:$28 sps:$4 sm:$0xff]  }
   0xe   :  { %1615 = vmatprep.subr.bf16.mxu1 %v2238_v16  ;;  %v2274_v40 = vld [vmem:[%s3366_s3 + $0x694] ss:$28 sps:$4 sm:$0xff]   ;;  %v2280_v44 = vld [vmem:[%s3366_s3 + $0x65c] ss:$28 sps:$4 sm:$0xff]   ;;  %v2284_v47 = vld [vmem:[%s3366_s3 + $0x2a4] ss:$28 sps:$4 sm:$0xff]  }
   0xf   :  { %v2276_v41 = vld [vmem:[%s3366_s3 + $0x310] ss:$28 sps:$4 sm:$0xff]   ;;  %v2282_v45 = vld [vmem:[%s3366_s3 + $0x2d8] ss:$28 sps:$4 sm:$0xff]   ;;  %v2286_v48 = vld [vmem:[%s3366_s3 + $0x624] ss:$28 sps:$4 sm:$0xff]  }
  0x10   :  { %1575 = vmatpush1.bf16.msra.mxu0 %v2240_v17  ;;  %v2277_v42 = vld [vmem:[%s3366_s3 + $0x690] ss:$28 sps:$4 sm:$0xff]   ;;  %v2283_v46 = vld [vmem:[%s3366_s3 + $0x658] ss:$28 sps:$4 sm:$0xff]   ;;  %v2288_v49 = vld [vmem:[%s3366_s3 + $0x2a0] ss:$28 sps:$4 sm:$0xff]  }
  0x11   :  { %1616 = vmatpush1.bf16.msra.mxu1 %v2241_v18  ;;  %1576 = vmatprep.subr.bf16.mxu0 %v2242_v19  ;;  %v2289_v50 = vld [vmem:[%s3366_s3 + $0x620] ss:$28 sps:$4 sm:$0xff]   ;;  %v2290_v51 = vld [vmem:[%s3366_s3 + $0x26c] ss:$28 sps:$4 sm:$0xff]   ;;  %v2296_v55 = vld [vmem:[%s3366_s3 + $0x234] ss:$28 sps:$4 sm:$0xff]  }
  0x12   :  { %1617 = vmatprep.subr.bf16.mxu1 %v2244_v20  ;;  %v2292_v52 = vld [vmem:[%s3366_s3 + $0x5ec] ss:$28 sps:$4 sm:$0xff]   ;;  %v2298_v56 = vld [vmem:[%s3366_s3 + $0x5b4] ss:$28 sps:$4 sm:$0xff]   ;;  %v2302_v59 = vld [vmem:[%s3366_s3 + $0x1fc] ss:$28 sps:$4 sm:$0xff]  }
  0x13   :  { %v2294_v53 = vld [vmem:[%s3366_s3 + $0x268] ss:$28 sps:$4 sm:$0xff]   ;;  %v2300_v57 = vld [vmem:[%s3366_s3 + $0x230] ss:$28 sps:$4 sm:$0xff]   ;;  %v2304_v60 = vld [vmem:[%s3366_s3 + $0x57c] ss:$28 sps:$4 sm:$0xff]  }
  0x14   :  { %1577 = vmatpush1.bf16.msra.mxu0 %v2246_v21  ;;  %v2295_v54 = vld [vmem:[%s3366_s3 + $0x5e8] ss:$28 sps:$4 sm:$0xff]   ;;  %v2301_v58 = vld [vmem:[%s3366_s3 + $0x5b0] ss:$28 sps:$4 sm:$0xff]   ;;  %v2306_v61 = vld [vmem:[%s3366_s3 + $0x1f8] ss:$28 sps:$4 sm:$0xff]  }
  0x15   :  { %1618 = vmatpush1.bf16.msra.mxu1 %v2247_v22  ;;  %1578 = vmatprep.subr.bf16.mxu0 %v2248_v23  ;;  %v2307_v62 = vld [vmem:[%s3366_s3 + $0x578] ss:$28 sps:$4 sm:$0xff]   ;;  %v2308_v63 = vld [vmem:[%s3366_s3 + $0x1c4] ss:$28 sps:$4 sm:$0xff]   ;;  %v2808_v6 = vshrl.u32 %v30_v5, 7 }
  0x16   :  { %1619 = vmatprep.subr.bf16.mxu1 %v2250_v24  ;;  %v2310_v0 = vld [vmem:[%s3366_s3 + $0x544] ss:$28 sps:$4 sm:$0xff]   ;;  %v2316_v3 = vld [vmem:[%s3366_s3 + $0x194] ss:$28 sps:$4 sm:$0xff]  }
  0x17   :  { %v2312_v1 = vld [vmem:[%s3366_s3 + $0x1c0] ss:$28 sps:$4 sm:$0xff]   ;;  %v2319_v4 = vld [vmem:[%s3366_s3 + $0x514] ss:$28 sps:$4 sm:$0xff]   ;;  %v2814_v8 = vsub.s32 0, %v2808_v6  ;;  %v2817_v9 = vsub.s32 1, %v2808_v6 }
  0x18   :  { %1579 = vmatpush1.bf16.msra.mxu0 %v2252_v25  ;;  %v2313_v2 = vld [vmem:[%s3366_s3 + $0x540] ss:$28 sps:$4 sm:$0xff]   ;;  %v2820_v10 = vsub.s32 2, %v2808_v6  ;;  %v2823_v11 = vsub.s32 3, %v2808_v6  ;;  %v2341_v5 = vld [vmem:[%s3366_s3 + $0x430] ss:$28 sps:$4 sm:$0xff]  }
  0x19   :  { %1620 = vmatpush1.bf16.msra.mxu1 %v2253_v26  ;;  %1580 = vmatprep.subr.bf16.mxu0 %v2254_v27  ;;  %v23_v7 = vld [vmem:[%s3364_s1] ss:$2 sm:$0xf]  ;;  %v1944_v12 = vld [vmem:[%s3364_s1 + $0x1] ss:$2 sm:$0xf] }
  0x1a   :  { %1621 = vmatprep.subr.bf16.mxu1 %v2256_v28  ;;  %v89_v14 = vld [vmem:[%s3365_s2] sm:$0xf]  ;;  %v33_v15 = vrot.slane %v23_v7, %v2814_v8  ;;  %v37_v16 = vrot.slane %v23_v7, %v2817_v9  ;;  %v41_v17 = vrot.slane %v23_v7, %v2820_v10  ;;  %v45_v18 = vrot.slane %v23_v7, %v2823_v11  ;;  %v2346_v7 = vld [vmem:[%s3366_s3 + $0x7c] ss:$28 sps:$4 sm:$0xff]  }
  0x1b   :  { %v64_v19 = vrot.slane %v1944_v12, %v2814_v8  ;;  %v68_v20 = vrot.slane %v1944_v12, %v2817_v9  ;;  %v72_v21 = vrot.slane %v1944_v12, %v2820_v10  ;;  %v76_v22 = vrot.slane %v1944_v12, %v2823_v11  ;;  %v2349_v12 = vld [vmem:[%s3366_s3 + $0x3fc] ss:$28 sps:$4 sm:$0xff]  }
  0x1c   :  { %1581 = vmatpush1.bf16.msra.mxu0 %v2258_v29  ;;  %v94_v23 = vrot.slane %v89_v14, %v2814_v8  ;;  %v98_v24 = vrot.slane %v89_v14, %v2817_v9  ;;  %v102_v25 = vrot.slane %v89_v14, %v2820_v10  ;;  %v106_v26 = vrot.slane %v89_v14, %v2823_v11 }
  0x1d   :  { %1622 = vmatpush1.bf16.msra.mxu1 %v2259_v30  ;;  %1582 = vmatprep.subr.bf16.mxu0 %v2260_v31 }
  0x1e   :  { %1623 = vmatprep.subr.bf16.mxu1 %v2262_v32 }
  0x20   :  { %1583 = vmatpush1.bf16.msra.mxu0 %v2264_v33 }
  0x21   :  { %1624 = vmatpush1.bf16.msra.mxu1 %v2265_v34  ;;  %1584 = vmatprep.subr.bf16.mxu0 %v2266_v35 }
  0x22   :  { %1625 = vmatprep.subr.bf16.mxu1 %v2268_v36 }
  0x24   :  { %1585 = vmatpush2.bf16.msra.mxu0 %v2270_v37 }
  0x25   :  { %1626 = vmatpush2.bf16.msra.mxu1 %v2271_v38  ;;  %1586 = vmatprep.subr.bf16.mxu0 %v2272_v39 }
  0x26   :  { %1627 = vmatprep.subr.bf16.mxu1 %v2274_v40 }
  0x28   :  { %1587 = vmatpush2.bf16.msra.mxu0 %v2276_v41 }
  0x29   :  { %1628 = vmatpush2.bf16.msra.mxu1 %v2277_v42  ;;  %1588 = vmatprep.subr.bf16.mxu0 %v2278_v43 }
  0x2a   :  { %1629 = vmatprep.subr.bf16.mxu1 %v2280_v44 }
  0x2c   :  { %1589 = vmatpush2.bf16.msra.mxu0 %v2282_v45 }
  0x2d   :  { %1630 = vmatpush2.bf16.msra.mxu1 %v2283_v46  ;;  %1590 = vmatprep.subr.bf16.mxu0 %v2284_v47  ;;  %v2314_v46 = vld [vmem:[%s3366_s3 + $0x190] ss:$28 sps:$4 sm:$0xff]  }
  0x2e   :  { %1631 = vmatprep.subr.bf16.mxu1 %v2286_v48  ;;  %v2317_v47 = vld [vmem:[%s3366_s3 + $0x510] ss:$28 sps:$4 sm:$0xff]  }
  0x30   :  { %1591 = vmatpush2.bf16.msra.mxu0 %v2288_v49 }
  0x31   :  { %1632 = vmatpush2.bf16.msra.mxu1 %v2289_v50  ;;  %1592 = vmatprep.subr.bf16.mxu0 %v2290_v51 }
  0x32   :  { %1633 = vmatprep.subr.bf16.mxu1 %v2292_v52 }
  0x34   :  { %1593 = vmatpush2.bf16.msra.mxu0 %v2294_v53 }
  0x35   :  { %1634 = vmatpush2.bf16.msra.mxu1 %v2295_v54  ;;  %1594 = vmatprep.subr.bf16.mxu0 %v2296_v55  ;;  %v2322_v54 = vld [vmem:[%s3366_s3 + $0x15c] ss:$28 sps:$4 sm:$0xff]  }
  0x36   :  { %1635 = vmatprep.subr.bf16.mxu1 %v2298_v56  ;;  %v2320_v55 = vld [vmem:[%s3366_s3 + $0x158] ss:$28 sps:$4 sm:$0xff]  }
  0x37   :  { %v2323_v56 = vld [vmem:[%s3366_s3 + $0x4d8] ss:$28 sps:$4 sm:$0xff]  }
  0x38   :  { %1595 = vmatpush2.bf16.msra.mxu0 %v2300_v57  ;;  %v2325_v57 = vld [vmem:[%s3366_s3 + $0x4dc] ss:$28 sps:$4 sm:$0xff]  }
  0x39   :  { %1636 = vmatpush2.bf16.msra.mxu1 %v2301_v58  ;;  %1596 = vmatprep.subr.bf16.mxu0 %v2302_v59  ;;  %v2328_v58 = vld [vmem:[%s3366_s3 + $0x124] ss:$28 sps:$4 sm:$0xff]  }
  0x3a   :  { %1637 = vmatprep.subr.bf16.mxu1 %v2304_v60  ;;  %v2331_v59 = vld [vmem:[%s3366_s3 + $0x4a4] ss:$28 sps:$4 sm:$0xff]  }
  0x3b   :  { %v2326_v60 = vld [vmem:[%s3366_s3 + $0x120] ss:$28 sps:$4 sm:$0xff]  }
  0x3c   :  { %1597 = vmatpush2.bf16.msra.mxu0 %v2306_v61  ;;  %v2329_v61 = vld [vmem:[%s3366_s3 + $0x4a0] ss:$28 sps:$4 sm:$0xff]  }
  0x3d   :  { %1638 = vmatpush2.bf16.msra.mxu1 %v2307_v62  ;;  %1598 = vmatprep.subr.bf16.mxu0 %v2308_v63  ;;  %v2334_v62 = vld [vmem:[%s3366_s3 + $0xec] ss:$28 sps:$4 sm:$0xff]  }
  0x3e   :  { %1639 = vmatprep.subr.bf16.mxu1 %v2310_v0  ;;  %v2337_v63 = vld [vmem:[%s3366_s3 + $0x46c] ss:$28 sps:$4 sm:$0xff]  }
  0x3f   :  { %v2332_v0 = vld [vmem:[%s3366_s3 + $0xe8] ss:$28 sps:$4 sm:$0xff]  }
  0x40   :  { %1599 = vmatpush2.bf16.msra.mxu0 %v2312_v1  ;;  %v2335_v1 = vld [vmem:[%s3366_s3 + $0x468] ss:$28 sps:$4 sm:$0xff]  }
  0x41   :  { %1640 = vmatpush2.bf16.msra.mxu1 %v2313_v2  ;;  %1650 = vmatprep.subr.bf16.mxu0 %v2316_v3  ;;  %v2340_v2 = vld [vmem:[%s3366_s3 + $0xb4] ss:$28 sps:$4 sm:$0xff]  }
  0x42   :  { %1691 = vmatprep.subr.bf16.mxu1 %v2319_v4  ;;  %v2343_v3 = vld [vmem:[%s3366_s3 + $0x434] ss:$28 sps:$4 sm:$0xff]  }
  0x43   :  { %v2338_v4 = vld [vmem:[%s3366_s3 + $0xb0] ss:$28 sps:$4 sm:$0xff]  }
  0x7d   :  { %v27_v13 = vpop.permute.xlu0 %26 }
  0x7e   :  { %v50_v27 = vmul.f32 %v33_v15, %v27_v13  ;;  %v51_v28 = vmul.f32 %v37_v16, %v27_v13  ;;  %v52_v29 = vmul.f32 %v41_v17, %v27_v13  ;;  %v53_v30 = vmul.f32 %v45_v18, %v27_v13 }
  0x82   :  { %v58_v31 = vpop.permute.xlu0 %57 }
  0x83   :  { %v81_v32 = vmul.f32 %v64_v19, %v58_v31  ;;  %v82_v33 = vmul.f32 %v68_v20, %v58_v31  ;;  %v83_v34 = vmul.f32 %v72_v21, %v58_v31  ;;  %v84_v35 = vmul.f32 %v76_v22, %v58_v31 }
  0x85   :  { %v85_v36 = vadd.f32 %v81_v32, %v50_v27  ;;  %v86_v37 = vadd.f32 %v82_v33, %v51_v28  ;;  %v87_v38 = vadd.f32 %v83_v34, %v52_v29  ;;  %v88_v39 = vadd.f32 %v84_v35, %v53_v30 }
  0x87   :  { %v111_v40 = vadd.f32 %v94_v23, %v85_v36  ;;  %v112_v41 = vadd.f32 %v98_v24, %v86_v37  ;;  %v113_v42 = vadd.f32 %v102_v25, %v87_v38  ;;  %v114_v43 = vadd.f32 %v106_v26, %v88_v39 }
  0x89   :  { %v116_v44 = vmax.f32 %v112_v41, 0.0  ;;  %v118_v45 = vmax.f32 %v114_v43, 0.0  ;;  %v115_v48 = vmax.f32 %v111_v40, 0.0  ;;  %v117_v49 = vmax.f32 %v113_v42, 0.0 }
  0x8b   :  { %v2849_v50 = vpack.c.bf16 %v116_v44, %v116_v44  ;;  %v2851_v51 = vpack.c.bf16 %v118_v45, %v118_v45  ;;  %v2853_v52 = vpack.c.bf16 %v115_v48, %v115_v48  ;;  %v2855_v53 = vpack.c.bf16 %v117_v49, %v117_v49 }
  0x8d   :  { %1600 = vmatprep.mubr.bf16.mxu0 %v2849_v50  ;;  %1641 = vmatprep.mubr.bf16.mxu1 %v2851_v51 }
  0x8e   :  { %1601 = vmatmul.mubr.bf16.vlgmr.msra.gmra.mxu0 %v2853_v52  ;;  %1642 = vmatmul.mubr.bf16.vlgmr.msra.gmra.mxu1 %v2855_v53 }
  0x8f   :  { %1651 = vmatpush1.bf16.msra.mxu0 %v2314_v46  ;;  %1692 = vmatpush1.bf16.msra.mxu1 %v2317_v47 }
  0x90   :  { %1682 = vmatprep.mubr.bf16.mxu0 %v2849_v50  ;;  %1723 = vmatprep.mubr.bf16.mxu1 %v2851_v51 }
  0x91   :  { %1652 = vmatprep.subr.bf16.mxu0 %v2322_v54  ;;  %1693 = vmatprep.subr.bf16.mxu1 %v2325_v57 }
  0x93   :  { %1653 = vmatpush1.bf16.msra.mxu0 %v2320_v55  ;;  %1694 = vmatpush1.bf16.msra.mxu1 %v2323_v56 }
  0x94   :  { %1654 = vmatprep.subr.bf16.mxu0 %v2328_v58  ;;  %1695 = vmatprep.subr.bf16.mxu1 %v2331_v59 }
  0x97   :  { %1655 = vmatpush1.bf16.msra.mxu0 %v2326_v60  ;;  %1696 = vmatpush1.bf16.msra.mxu1 %v2329_v61 }
  0x98   :  { %1656 = vmatprep.subr.bf16.mxu0 %v2334_v62  ;;  %1697 = vmatprep.subr.bf16.mxu1 %v2337_v63 }
  0x9b   :  { %1657 = vmatpush1.bf16.msra.mxu0 %v2332_v0  ;;  %1698 = vmatpush1.bf16.msra.mxu1 %v2335_v1 }
  0x9c   :  { %1658 = vmatprep.subr.bf16.mxu0 %v2340_v2  ;;  %1699 = vmatprep.subr.bf16.mxu1 %v2343_v3 }
  0x9d   :  { %10 = vsyncpa [#allocation3], 0  ;;  %v2344_v13 = vld [vmem:[%s3366_s3 + $0x78] ss:$28 sps:$4 sm:$0xff]   ;;  %v2352_v15 = vld [vmem:[%s3366_s3 + $0x44] ss:$28 sps:$4 sm:$0xff]  }
  0x9e   :  { %v2347_v14 = vld [vmem:[%s3366_s3 + $0x3f8] ss:$28 sps:$4 sm:$0xff]   ;;  %v2355_v16 = vld [vmem:[%s3366_s3 + $0x3c4] ss:$28 sps:$4 sm:$0xff]   ;;  %v2358_v19 = vld [vmem:[%s3366_s3 + $0xc] ss:$28 sps:$4 sm:$0xff]  }
  0x9f   :  { %1659 = vmatpush1.bf16.msra.mxu0 %v2338_v4  ;;  %1700 = vmatpush1.bf16.msra.mxu1 %v2341_v5  ;;  %v2350_v17 = vld [vmem:[%s3366_s3 + $0x40] ss:$28 sps:$4 sm:$0xff]   ;;  %v2361_v20 = vld [vmem:[%s3366_s3 + $0x38c] ss:$28 sps:$4 sm:$0xff]   ;;  %v2364_v23 = vld [vmem:[%s3366_s3 + $0x354] ss:$28 sps:$4 sm:$0xff]  }
  0xa0   :  { %1660 = vmatprep.subr.bf16.mxu0 %v2346_v7  ;;  %1701 = vmatprep.subr.bf16.mxu1 %v2349_v12  ;;  %v2353_v18 = vld [vmem:[%s3366_s3 + $0x3c0] ss:$28 sps:$4 sm:$0xff]   ;;  %v2356_v21 = vld [vmem:[%s3366_s3 + $0x8] ss:$28 sps:$4 sm:$0xff]   ;;  %v2367_v24 = vld [vmem:[%s3366_s3 + $0x6d4] ss:$28 sps:$4 sm:$0xff]  }
  0xa1   :  { %v2359_v22 = vld [vmem:[%s3366_s3 + $0x388] ss:$28 sps:$4 sm:$0xff]   ;;  %v2362_v25 = vld [vmem:[%s3366_s3 + $0x350] ss:$28 sps:$4 sm:$0xff]   ;;  %v2370_v27 = vld [vmem:[%s3366_s3 + $0x31c] ss:$28 sps:$4 sm:$0xff]  }
  0xa2   :  { %v2365_v26 = vld [vmem:[%s3366_s3 + $0x6d0] ss:$28 sps:$4 sm:$0xff]   ;;  %v2373_v28 = vld [vmem:[%s3366_s3 + $0x69c] ss:$28 sps:$4 sm:$0xff]   ;;  %v2376_v31 = vld [vmem:[%s3366_s3 + $0x2e4] ss:$28 sps:$4 sm:$0xff]  }
  0xa3   :  { %1661 = vmatpush1.bf16.msra.mxu0 %v2344_v13  ;;  %1702 = vmatpush1.bf16.msra.mxu1 %v2347_v14  ;;  %v2368_v29 = vld [vmem:[%s3366_s3 + $0x318] ss:$28 sps:$4 sm:$0xff]   ;;  %v2379_v32 = vld [vmem:[%s3366_s3 + $0x664] ss:$28 sps:$4 sm:$0xff]   ;;  %v2382_v35 = vld [vmem:[%s3366_s3 + $0x2ac] ss:$28 sps:$4 sm:$0xff]  }
  0xa4   :  { %1662 = vmatprep.subr.bf16.mxu0 %v2352_v15  ;;  %1703 = vmatprep.subr.bf16.mxu1 %v2355_v16  ;;  %v2371_v30 = vld [vmem:[%s3366_s3 + $0x698] ss:$28 sps:$4 sm:$0xff]   ;;  %v2374_v33 = vld [vmem:[%s3366_s3 + $0x2e0] ss:$28 sps:$4 sm:$0xff]   ;;  %v2385_v36 = vld [vmem:[%s3366_s3 + $0x62c] ss:$28 sps:$4 sm:$0xff]  }
  0xa5   :  { %v2377_v34 = vld [vmem:[%s3366_s3 + $0x660] ss:$28 sps:$4 sm:$0xff]   ;;  %v2380_v37 = vld [vmem:[%s3366_s3 + $0x2a8] ss:$28 sps:$4 sm:$0xff]   ;;  %v2388_v39 = vld [vmem:[%s3366_s3 + $0x274] ss:$28 sps:$4 sm:$0xff]  }
  0xa6   :  { %v2383_v38 = vld [vmem:[%s3366_s3 + $0x628] ss:$28 sps:$4 sm:$0xff]   ;;  %v2391_v40 = vld [vmem:[%s3366_s3 + $0x5f4] ss:$28 sps:$4 sm:$0xff]   ;;  %v2394_v43 = vld [vmem:[%s3366_s3 + $0x23c] ss:$28 sps:$4 sm:$0xff]  }
  0xa7   :  { %1663 = vmatpush1.bf16.msra.mxu0 %v2350_v17  ;;  %1704 = vmatpush1.bf16.msra.mxu1 %v2353_v18  ;;  %v2386_v41 = vld [vmem:[%s3366_s3 + $0x270] ss:$28 sps:$4 sm:$0xff]   ;;  %v2397_v44 = vld [vmem:[%s3366_s3 + $0x5bc] ss:$28 sps:$4 sm:$0xff]   ;;  %v2400_v47 = vld [vmem:[%s3366_s3 + $0x204] ss:$28 sps:$4 sm:$0xff]  }
  0xa8   :  { %1664 = vmatprep.subr.bf16.mxu0 %v2358_v19  ;;  %1705 = vmatprep.subr.bf16.mxu1 %v2361_v20  ;;  %v2389_v42 = vld [vmem:[%s3366_s3 + $0x5f0] ss:$28 sps:$4 sm:$0xff]   ;;  %v2392_v45 = vld [vmem:[%s3366_s3 + $0x238] ss:$28 sps:$4 sm:$0xff]   ;;  %v2403_v48 = vld [vmem:[%s3366_s3 + $0x584] ss:$28 sps:$4 sm:$0xff]  }
  0xa9   :  { %v2395_v46 = vld [vmem:[%s3366_s3 + $0x5b8] ss:$28 sps:$4 sm:$0xff]   ;;  %v2398_v49 = vld [vmem:[%s3366_s3 + $0x200] ss:$28 sps:$4 sm:$0xff]   ;;  %v2406_v55 = vld [vmem:[%s3366_s3 + $0x1cc] ss:$28 sps:$4 sm:$0xff]  }
  0xaa   :  { %v2401_v54 = vld [vmem:[%s3366_s3 + $0x580] ss:$28 sps:$4 sm:$0xff]   ;;  %v2409_v56 = vld [vmem:[%s3366_s3 + $0x54c] ss:$28 sps:$4 sm:$0xff]   ;;  %v2410_v61 = vld [vmem:[%s3366_s3 + $0x198] ss:$28 sps:$4 sm:$0xff]  }
  0xab   :  { %1665 = vmatpush1.bf16.msra.mxu0 %v2356_v21  ;;  %1706 = vmatpush1.bf16.msra.mxu1 %v2359_v22  ;;  %v2404_v57 = vld [vmem:[%s3366_s3 + $0x1c8] ss:$28 sps:$4 sm:$0xff]   ;;  %v2412_v59 = vld [vmem:[%s3366_s3 + $0x19c] ss:$28 sps:$4 sm:$0xff]   ;;  %v2430_v12 = vld [vmem:[%s3366_s3 + $0xf4] ss:$28 sps:$4 sm:$0xff]  }
  0xac   :  { %1666 = vmatprep.subr.bf16.mxu0 %v2364_v23  ;;  %1707 = vmatprep.subr.bf16.mxu1 %v2367_v24  ;;  %v2407_v58 = vld [vmem:[%s3366_s3 + $0x548] ss:$28 sps:$4 sm:$0xff]   ;;  %v2415_v60 = vld [vmem:[%s3366_s3 + $0x51c] ss:$28 sps:$4 sm:$0xff]   ;;  %v2433_v13 = vld [vmem:[%s3366_s3 + $0x474] ss:$28 sps:$4 sm:$0xff]  }
  0xad   :  { %v2413_v62 = vld [vmem:[%s3366_s3 + $0x518] ss:$28 sps:$4 sm:$0xff]   ;;  %v2418_v63 = vld [vmem:[%s3366_s3 + $0x164] ss:$28 sps:$4 sm:$0xff]   ;;  %v2424_v3 = vld [vmem:[%s3366_s3 + $0x12c] ss:$28 sps:$4 sm:$0xff]  }
  0xae   :  { %v2421_v0 = vld [vmem:[%s3366_s3 + $0x4e4] ss:$28 sps:$4 sm:$0xff]   ;;  %v2427_v4 = vld [vmem:[%s3366_s3 + $0x4ac] ss:$28 sps:$4 sm:$0xff]   ;;  %v2436_v16 = vld [vmem:[%s3366_s3 + $0xbc] ss:$28 sps:$4 sm:$0xff]  }
  0xaf   :  { %1667 = vmatpush2.bf16.msra.mxu0 %v2362_v25  ;;  %1708 = vmatpush2.bf16.msra.mxu1 %v2365_v26  ;;  %v2416_v1 = vld [vmem:[%s3366_s3 + $0x160] ss:$28 sps:$4 sm:$0xff]   ;;  %v2422_v5 = vld [vmem:[%s3366_s3 + $0x128] ss:$28 sps:$4 sm:$0xff]   ;;  %v2428_v14 = vld [vmem:[%s3366_s3 + $0xf0] ss:$28 sps:$4 sm:$0xff]  }
  0xb0   :  { %1668 = vmatprep.subr.bf16.mxu0 %v2370_v27  ;;  %1709 = vmatprep.subr.bf16.mxu1 %v2373_v28  ;;  %v2419_v2 = vld [vmem:[%s3366_s3 + $0x4e0] ss:$28 sps:$4 sm:$0xff]   ;;  %v2425_v7 = vld [vmem:[%s3366_s3 + $0x4a8] ss:$28 sps:$4 sm:$0xff]   ;;  %v2431_v15 = vld [vmem:[%s3366_s3 + $0x470] ss:$28 sps:$4 sm:$0xff]  }
  0xb1   :  { %v2439_v17 = vld [vmem:[%s3366_s3 + $0x43c] ss:$28 sps:$4 sm:$0xff]   ;;  %v2442_v20 = vld [vmem:[%s3366_s3 + $0x84] ss:$28 sps:$4 sm:$0xff]   ;;  %v2448_v24 = vld [vmem:[%s3366_s3 + $0x4c] ss:$28 sps:$4 sm:$0xff]  }
  0xb2   :  { %v2434_v18 = vld [vmem:[%s3366_s3 + $0xb8] ss:$28 sps:$4 sm:$0xff]   ;;  %v2445_v21 = vld [vmem:[%s3366_s3 + $0x404] ss:$28 sps:$4 sm:$0xff]   ;;  %v2451_v25 = vld [vmem:[%s3366_s3 + $0x3cc] ss:$28 sps:$4 sm:$0xff]  }
  0xb3   :  { %1669 = vmatpush2.bf16.msra.mxu0 %v2368_v29  ;;  %1710 = vmatpush2.bf16.msra.mxu1 %v2371_v30  ;;  %v2437_v19 = vld [vmem:[%s3366_s3 + $0x438] ss:$28 sps:$4 sm:$0xff]   ;;  %v2440_v22 = vld [vmem:[%s3366_s3 + $0x80] ss:$28 sps:$4 sm:$0xff]   ;;  %v2446_v26 = vld [vmem:[%s3366_s3 + $0x48] ss:$28 sps:$4 sm:$0xff]  }
  0xb4   :  { %1670 = vmatprep.subr.bf16.mxu0 %v2376_v31  ;;  %1711 = vmatprep.subr.bf16.mxu1 %v2379_v32  ;;  %v2443_v23 = vld [vmem:[%s3366_s3 + $0x400] ss:$28 sps:$4 sm:$0xff]   ;;  %v2449_v27 = vld [vmem:[%s3366_s3 + $0x3c8] ss:$28 sps:$4 sm:$0xff]   ;;  %v2454_v28 = vld [vmem:[%s3366_s3 + $0x14] ss:$28 sps:$4 sm:$0xff]  }
  0xb5   :  { %v2457_v29 = vld [vmem:[%s3366_s3 + $0x394] ss:$28 sps:$4 sm:$0xff]   ;;  %v2460_v32 = vld [vmem:[%s3366_s3 + $0x35c] ss:$28 sps:$4 sm:$0xff]   ;;  %vm1928_vm0 = vcmask 130048  }
  0xb6   :  { %v2452_v30 = vld [vmem:[%s3366_s3 + $0x10] ss:$28 sps:$4 sm:$0xff]  }
  0xb7   :  { %1671 = vmatpush2.bf16.msra.mxu0 %v2374_v33  ;;  %1712 = vmatpush2.bf16.msra.mxu1 %v2377_v34  ;;  %v2455_v31 = vld [vmem:[%s3366_s3 + $0x390] ss:$28 sps:$4 sm:$0xff]   ;;  %v2463_v33 = vld [vmem:[%s3366_s3 + $0x6dc] ss:$28 sps:$4 sm:$0xff]  }
  0xb8   :  { %1672 = vmatprep.subr.bf16.mxu0 %v2382_v35  ;;  %1713 = vmatprep.subr.bf16.mxu1 %v2385_v36  ;;  %v2458_v34 = vld [vmem:[%s3366_s3 + $0x358] ss:$28 sps:$4 sm:$0xff]   ;;  %v2466_v36 = vld [vmem:[%s3366_s3 + $0x324] ss:$28 sps:$4 sm:$0xff]  }
  0xb9   :  { %v2461_v35 = vld [vmem:[%s3366_s3 + $0x6d8] ss:$28 sps:$4 sm:$0xff]  }
  0xbb   :  { %1673 = vmatpush2.bf16.msra.mxu0 %v2380_v37  ;;  %1714 = vmatpush2.bf16.msra.mxu1 %v2383_v38  ;;  %v2469_v37 = vld [vmem:[%s3366_s3 + $0x6a4] ss:$28 sps:$4 sm:$0xff]  }
  0xbc   :  { %1674 = vmatprep.subr.bf16.mxu0 %v2388_v39  ;;  %1715 = vmatprep.subr.bf16.mxu1 %v2391_v40  ;;  %v2464_v38 = vld [vmem:[%s3366_s3 + $0x320] ss:$28 sps:$4 sm:$0xff]   ;;  %v2472_v40 = vld [vmem:[%s3366_s3 + $0x2ec] ss:$28 sps:$4 sm:$0xff]  }
  0xbd   :  { %v2467_v39 = vld [vmem:[%s3366_s3 + $0x6a0] ss:$28 sps:$4 sm:$0xff]  }
  0xbf   :  { %1675 = vmatpush2.bf16.msra.mxu0 %v2386_v41  ;;  %1716 = vmatpush2.bf16.msra.mxu1 %v2389_v42  ;;  %v2475_v41 = vld [vmem:[%s3366_s3 + $0x66c] ss:$28 sps:$4 sm:$0xff]  }
  0xc0   :  { %1676 = vmatprep.subr.bf16.mxu0 %v2394_v43  ;;  %1717 = vmatprep.subr.bf16.mxu1 %v2397_v44  ;;  %v2470_v42 = vld [vmem:[%s3366_s3 + $0x2e8] ss:$28 sps:$4 sm:$0xff]   ;;  %v2478_v44 = vld [vmem:[%s3366_s3 + $0x2b4] ss:$28 sps:$4 sm:$0xff]  }
  0xc1   :  { %v2473_v43 = vld [vmem:[%s3366_s3 + $0x668] ss:$28 sps:$4 sm:$0xff]  }
  0xc3   :  { %1677 = vmatpush2.bf16.msra.mxu0 %v2392_v45  ;;  %1718 = vmatpush2.bf16.msra.mxu1 %v2395_v46  ;;  %v2481_v45 = vld [vmem:[%s3366_s3 + $0x634] ss:$28 sps:$4 sm:$0xff]  }
  0xc4   :  { %1678 = vmatprep.subr.bf16.mxu0 %v2400_v47  ;;  %1719 = vmatprep.subr.bf16.mxu1 %v2403_v48  ;;  %v2476_v46 = vld [vmem:[%s3366_s3 + $0x2b0] ss:$28 sps:$4 sm:$0xff]   ;;  %v2484_v48 = vld [vmem:[%s3366_s3 + $0x27c] ss:$28 sps:$4 sm:$0xff]  }
  0xc5   :  { %v2479_v47 = vld [vmem:[%s3366_s3 + $0x630] ss:$28 sps:$4 sm:$0xff]  }
  0xc7   :  { %1679 = vmatpush2.bf16.msra.mxu0 %v2398_v49  ;;  %1720 = vmatpush2.bf16.msra.mxu1 %v2401_v54  ;;  %v2487_v49 = vld [vmem:[%s3366_s3 + $0x5fc] ss:$28 sps:$4 sm:$0xff]  }
  0xc8   :  { %1680 = vmatprep.subr.bf16.mxu0 %v2406_v55  ;;  %1721 = vmatprep.subr.bf16.mxu1 %v2409_v56  ;;  %v2482_v54 = vld [vmem:[%s3366_s3 + $0x278] ss:$28 sps:$4 sm:$0xff]   ;;  %v2490_v56 = vld [vmem:[%s3366_s3 + $0x244] ss:$28 sps:$4 sm:$0xff]  }
  0xc9   :  { %v2485_v55 = vld [vmem:[%s3366_s3 + $0x5f8] ss:$28 sps:$4 sm:$0xff]  }
  0xcb   :  { %1681 = vmatpush2.bf16.msra.mxu0 %v2404_v57  ;;  %1722 = vmatpush2.bf16.msra.mxu1 %v2407_v58  ;;  %v2493_v57 = vld [vmem:[%s3366_s3 + $0x5c4] ss:$28 sps:$4 sm:$0xff]  }
  0xcc   :  { %1732 = vmatprep.subr.bf16.mxu0 %v2412_v59  ;;  %1773 = vmatprep.subr.bf16.mxu1 %v2415_v60  ;;  %v2488_v58 = vld [vmem:[%s3366_s3 + $0x240] ss:$28 sps:$4 sm:$0xff]   ;;  %v2496_v60 = vld [vmem:[%s3366_s3 + $0x20c] ss:$28 sps:$4 sm:$0xff]  }
  0xcd   :  { %v2491_v59 = vld [vmem:[%s3366_s3 + $0x5c0] ss:$28 sps:$4 sm:$0xff]  }
  0xce   :  { %1683 = vmatmul.mubr.bf16.vlgmr.msra.gmra.mxu0 %v2853_v52  ;;  %1724 = vmatmul.mubr.bf16.vlgmr.msra.gmra.mxu1 %v2855_v53 }
  0xcf   :  { %1733 = vmatpush1.bf16.msra.mxu0 %v2410_v61  ;;  %1764 = vmatprep.mubr.bf16.mxu0 %v2849_v50  ;;  %v2499_v61 = vld [vmem:[%s3366_s3 + $0x58c] ss:$28 sps:$4 sm:$0xff]  }
  0xd0   :  { %1774 = vmatpush1.bf16.msra.mxu1 %v2413_v62  ;;  %1805 = vmatprep.mubr.bf16.mxu1 %v2851_v51  ;;  %v2494_v62 = vld [vmem:[%s3366_s3 + $0x208] ss:$28 sps:$4 sm:$0xff]  }
  0xd1   :  { %1734 = vmatprep.subr.bf16.mxu0 %v2418_v63  ;;  %1775 = vmatprep.subr.bf16.mxu1 %v2421_v0  ;;  %v2497_v63 = vld [vmem:[%s3366_s3 + $0x588] ss:$28 sps:$4 sm:$0xff]   ;;  %v2502_v0 = vld [vmem:[%s3366_s3 + $0x1d4] ss:$28 sps:$4 sm:$0xff]  }
  0xd3   :  { %1735 = vmatpush1.bf16.msra.mxu0 %v2416_v1  ;;  %v2505_v1 = vld [vmem:[%s3366_s3 + $0x554] ss:$28 sps:$4 sm:$0xff]  }
  0xd4   :  { %1776 = vmatpush1.bf16.msra.mxu1 %v2419_v2  ;;  %1736 = vmatprep.subr.bf16.mxu0 %v2424_v3  ;;  %v2500_v2 = vld [vmem:[%s3366_s3 + $0x1d0] ss:$28 sps:$4 sm:$0xff]  }
  0xd5   :  { %1777 = vmatprep.subr.bf16.mxu1 %v2427_v4  ;;  %v2503_v3 = vld [vmem:[%s3366_s3 + $0x550] ss:$28 sps:$4 sm:$0xff]   ;;  %v2506_v4 = vld [vmem:[%s3366_s3 + $0x360] ss:$28 sps:$4 sm:$0xff]  }
  0xd7   :  { %1737 = vmatpush1.bf16.msra.mxu0 %v2422_v5  ;;  %v2507_v5 = vld [vmem:[%s3366_s3 + $0x6e0] ss:$28 sps:$4 sm:$0xff]  }
  0xd8   :  { %1778 = vmatpush1.bf16.msra.mxu1 %v2425_v7  ;;  %1738 = vmatprep.subr.bf16.mxu0 %v2430_v12  ;;  %v2508_v7 = vld [vmem:[%s3366_s3 + $0x1a0] ss:$28 sps:$4 sm:$0xff]  }
  0xd9   :  { %1779 = vmatprep.subr.bf16.mxu1 %v2433_v13  ;;  %v2509_v12 = vld [vmem:[%s3366_s3 + $0x520] ss:$28 sps:$4 sm:$0xff]   ;;  %v2510_v13 = vld [vmem:[%s3366_s3 + $0x328] ss:$28 sps:$4 sm:$0xff]  }
  0xdb   :  { %1739 = vmatpush1.bf16.msra.mxu0 %v2428_v14  ;;  %v2511_v14 = vld [vmem:[%s3366_s3 + $0x6a8] ss:$28 sps:$4 sm:$0xff]  }
  0xdc   :  { %1780 = vmatpush1.bf16.msra.mxu1 %v2431_v15  ;;  %1740 = vmatprep.subr.bf16.mxu0 %v2436_v16  ;;  %v2512_v15 = vld [vmem:[%s3366_s3 + $0x168] ss:$28 sps:$4 sm:$0xff]  }
  0xdd   :  { %1781 = vmatprep.subr.bf16.mxu1 %v2439_v17  ;;  %v2513_v16 = vld [vmem:[%s3366_s3 + $0x4e8] ss:$28 sps:$4 sm:$0xff]   ;;  %v2514_v17 = vld [vmem:[%s3366_s3 + $0x2f0] ss:$28 sps:$4 sm:$0xff]  }
  0xdf   :  { %1741 = vmatpush1.bf16.msra.mxu0 %v2434_v18  ;;  %v2515_v18 = vld [vmem:[%s3366_s3 + $0x670] ss:$28 sps:$4 sm:$0xff]  }
  0xe0   :  { %1782 = vmatpush1.bf16.msra.mxu1 %v2437_v19  ;;  %1742 = vmatprep.subr.bf16.mxu0 %v2442_v20  ;;  %v2517_v19 = vld [vmem:[%s3366_s3 + $0x4b0] ss:$28 sps:$4 sm:$0xff]   ;;  %v2519_v20 = vld [vmem:[%s3366_s3 + $0x638] ss:$28 sps:$4 sm:$0xff]  }
  0xe1   :  { %1783 = vmatprep.subr.bf16.mxu1 %v2445_v21  ;;  %v2520_v21 = vld [vmem:[%s3366_s3 + $0xf8] ss:$28 sps:$4 sm:$0xff]  }
  0xe3   :  { %1743 = vmatpush1.bf16.msra.mxu0 %v2440_v22  ;;  %v2521_v22 = vld [vmem:[%s3366_s3 + $0x478] ss:$28 sps:$4 sm:$0xff]  }
  0xe4   :  { %1784 = vmatpush1.bf16.msra.mxu1 %v2443_v23  ;;  %1744 = vmatprep.subr.bf16.mxu0 %v2448_v24  ;;  %v2522_v23 = vld [vmem:[%s3366_s3 + $0x280] ss:$28 sps:$4 sm:$0xff]  }
  0xe5   :  { %1785 = vmatprep.subr.bf16.mxu1 %v2451_v25  ;;  %v2523_v24 = vld [vmem:[%s3366_s3 + $0x600] ss:$28 sps:$4 sm:$0xff]  }
  0xe6   :  { %v2524_v25 = vld [vmem:[%s3366_s3 + $0xc0] ss:$28 sps:$4 sm:$0xff]  }
  0xe7   :  { %1745 = vmatpush1.bf16.msra.mxu0 %v2446_v26  ;;  %v2525_v26 = vld [vmem:[%s3366_s3 + $0x440] ss:$28 sps:$4 sm:$0xff]  }
  0xe8   :  { %1786 = vmatpush1.bf16.msra.mxu1 %v2449_v27  ;;  %1746 = vmatprep.subr.bf16.mxu0 %v2454_v28  ;;  %v2526_v27 = vld [vmem:[%s3366_s3 + $0x248] ss:$28 sps:$4 sm:$0xff]  }
  0xe9   :  { %1787 = vmatprep.subr.bf16.mxu1 %v2457_v29  ;;  %v2527_v28 = vld [vmem:[%s3366_s3 + $0x5c8] ss:$28 sps:$4 sm:$0xff]  }
  0xea   :  { %v2528_v29 = vld [vmem:[%s3366_s3 + $0x88] ss:$28 sps:$4 sm:$0xff]  }
  0xeb   :  { %1747 = vmatpush1.bf16.msra.mxu0 %v2452_v30  ;;  %v2529_v30 = vld [vmem:[%s3366_s3 + $0x408] ss:$28 sps:$4 sm:$0xff]  }
  0xec   :  { %1788 = vmatpush1.bf16.msra.mxu1 %v2455_v31  ;;  %1748 = vmatprep.subr.bf16.mxu0 %v2460_v32  ;;  %v2530_v31 = vld [vmem:[%s3366_s3 + $0x210] ss:$28 sps:$4 sm:$0xff]  }
  0xed   :  { %1789 = vmatprep.subr.bf16.mxu1 %v2463_v33  ;;  %v2531_v32 = vld [vmem:[%s3366_s3 + $0x590] ss:$28 sps:$4 sm:$0xff]  }
  0xee   :  { %v2532_v33 = vld [vmem:[%s3366_s3 + $0x50] ss:$28 sps:$4 sm:$0xff]  }
  0xef   :  { %1749 = vmatpush2.bf16.msra.mxu0 %v2458_v34  ;;  %v2533_v34 = vld [vmem:[%s3366_s3 + $0x3d0] ss:$28 sps:$4 sm:$0xff]  }
  0xf0   :  { %1790 = vmatpush2.bf16.msra.mxu1 %v2461_v35  ;;  %1750 = vmatprep.subr.bf16.mxu0 %v2466_v36  ;;  %v2534_v35 = vld [vmem:[%s3366_s3 + $0x1d8] ss:$28 sps:$4 sm:$0xff]  }
  0xf1   :  { %1791 = vmatprep.subr.bf16.mxu1 %v2469_v37  ;;  %v2535_v36 = vld [vmem:[%s3366_s3 + $0x558] ss:$28 sps:$4 sm:$0xff]  }
  0xf2   :  { %v2536_v37 = vld [vmem:[%s3366_s3 + $0x18] ss:$28 sps:$4 sm:$0xff]  }
  0xf3   :  { %1751 = vmatpush2.bf16.msra.mxu0 %v2464_v38  ;;  %v2537_v38 = vld [vmem:[%s3366_s3 + $0x398] ss:$28 sps:$4 sm:$0xff]  }
  0xf4   :  { %1792 = vmatpush2.bf16.msra.mxu1 %v2467_v39  ;;  %1752 = vmatprep.subr.bf16.mxu0 %v2472_v40  ;;  %v3344_v39 = vld [vmem:[%s3367_s4] sm:$0x7f] }
  0xf5   :  { %1793 = vmatprep.subr.bf16.mxu1 %v2475_v41  ;;  %v384_v40 = vrot.slane %v3344_v39, %v2814_v8  ;;  %v388_v41 = vrot.slane %v3344_v39, %v2817_v9 }
  0xf7   :  { %1753 = vmatpush2.bf16.msra.mxu0 %v2470_v42 }
  0xf8   :  { %1794 = vmatpush2.bf16.msra.mxu1 %v2473_v43  ;;  %1754 = vmatprep.subr.bf16.mxu0 %v2478_v44 }
  0xf9   :  { %1795 = vmatprep.subr.bf16.mxu1 %v2481_v45 }
  0xfb   :  { %1755 = vmatpush2.bf16.msra.mxu0 %v2476_v46 }
  0xfc   :  { %1796 = vmatpush2.bf16.msra.mxu1 %v2479_v47  ;;  %1756 = vmatprep.subr.bf16.mxu0 %v2484_v48 }
  0xfd   :  { %1797 = vmatprep.subr.bf16.mxu1 %v2487_v49 }
  0xff   :  { %1757 = vmatpush2.bf16.msra.mxu0 %v2482_v54 }
 0x100   :  { %1798 = vmatpush2.bf16.msra.mxu1 %v2485_v55  ;;  %1758 = vmatprep.subr.bf16.mxu0 %v2490_v56 }
 0x101   :  { %1799 = vmatprep.subr.bf16.mxu1 %v2493_v57 }
 0x103   :  { %1759 = vmatpush2.bf16.msra.mxu0 %v2488_v58 }
 0x104   :  { %1800 = vmatpush2.bf16.msra.mxu1 %v2491_v59  ;;  %1760 = vmatprep.subr.bf16.mxu0 %v2496_v60 }
 0x105   :  { %1801 = vmatprep.subr.bf16.mxu1 %v2499_v61 }
 0x107   :  { %1761 = vmatpush2.bf16.msra.mxu0 %v2494_v62  ;;  %v392_v62 = vrot.slane %v3344_v39, %v2820_v10 }
 0x108   :  { %1802 = vmatpush2.bf16.msra.mxu1 %v2497_v63  ;;  %1762 = vmatprep.subr.bf16.mxu0 %v2502_v0  ;;  %v396_v63 = vrot.slane %v3344_v39, %v2823_v11 }
 0x109   :  { %1803 = vmatprep.subr.bf16.mxu1 %v2505_v1 }
 0x10b   :  { %1763 = vmatpush2.bf16.msra.mxu0 %v2500_v2 }
 0x10c   :  { %1804 = vmatpush2.bf16.msra.mxu1 %v2503_v3  ;;  %2169 = vmatprep.subr.bf16.mxu0 %v2506_v4 }
 0x10d   :  { %2191 = vmatprep.subr.bf16.mxu1 %v2507_v5 }
 0x10e   :  { %1765 = vmatmul.mubr.bf16.vlgmr.msra.gmra.mxu0 %v2853_v52 }
 0x10f   :  { %1806 = vmatmul.mubr.bf16.vlgmr.msra.gmra.mxu1 %v2855_v53  ;;  %2170 = vmatpush3.bf16.msra.mxu0 %v2508_v7 }
 0x110   :  { %1846 = vmatprep.mubr.bf16.mxu0 %v2849_v50  ;;  %2192 = vmatpush3.bf16.msra.mxu1 %v2509_v12  ;;  %v2516_v50 = vld [vmem:[%s3366_s3 + $0x130] ss:$28 sps:$4 sm:$0xff]  }
 0x111   :  { %1886 = vmatprep.mubr.bf16.mxu1 %v2851_v51  ;;  %2171 = vmatprep.subr.bf16.mxu0 %v2510_v13  ;;  %v2518_v51 = vld [vmem:[%s3366_s3 + $0x2b8] ss:$28 sps:$4 sm:$0xff]   ;;  %s2576_s3 = smov [#allocation2]  }
 0x112   :  { %2193 = vmatprep.subr.bf16.mxu1 %v2511_v14  ;;  %s1936_s4 = sshll.u32 %s2576_s3, 4  ;;  %s1937_s4 = int_to_ptr.vmem [resolvable:$true] %s1936_s4 }
 0x113   :  { %2172 = vmatpush3.bf16.msra.mxu0 %v2512_v15  ;;  %s2552_s10 = scalar_lea.vmem %s1937_s4, 896  ;;  %p2557_p1 = scmp.lt.s32.totalorder %s1937_s4, %s1937_s4 }
 0x114   :  { %2194 = vmatpush3.bf16.msra.mxu1 %v2513_v16  ;;  %2173 = vmatprep.subr.bf16.mxu0 %v2514_v17  ;;  %p2553_p0 = scmp.ne.s32.totalorder %s1937_s4, %s2552_s10  ;;  %p2558_p2 = scmp.lt.s32.totalorder %s2552_s10, %s2552_s10 }
 0x115   :  { %2195 = vmatprep.subr.bf16.mxu1 %v2515_v18 }
 0x116   :  { %p2559_p3 = por %p2558_p2, %p2557_p1 }
 0x117   :  { %2174 = vmatpush3.bf16.msra.mxu0 %v2516_v50 }
 0x118   :  { %2196 = vmatpush3.bf16.msra.mxu1 %v2517_v19  ;;  %2175 = vmatprep.subr.bf16.mxu0 %v2518_v51  ;;  %p2560_p4 = pnand %p2559_p3, %p2553_p0 }
 0x119   :  { %2197 = vmatprep.subr.bf16.mxu1 %v2519_v20 }
 0x11b   :  { %2176 = vmatpush3.bf16.msra.mxu0 %v2520_v21  ;;  %v399_v21 = vsub.s32 4, %v2808_v6 }
 0x11c   :  { %2198 = vmatpush3.bf16.msra.mxu1 %v2521_v22  ;;  %2177 = vmatprep.subr.bf16.mxu0 %v2522_v23  ;;  %v403_v22 = vsub.s32 5, %v2808_v6 }
 0x11d   :  { %2199 = vmatprep.subr.bf16.mxu1 %v2523_v24  ;;  %v400_v23 = vrot.slane %v3344_v39, %v399_v21 }
 0x11e   :  { %v404_v24 = vrot.slane %v3344_v39, %v403_v22 }
 0x11f   :  { %2178 = vmatpush3.bf16.msra.mxu0 %v2524_v25 }
 0x120   :  { %2200 = vmatpush3.bf16.msra.mxu1 %v2525_v26  ;;  %2179 = vmatprep.subr.bf16.mxu0 %v2526_v27 }
 0x121   :  { %2201 = vmatprep.subr.bf16.mxu1 %v2527_v28 }
 0x123   :  { %2180 = vmatpush3.bf16.msra.mxu0 %v2528_v29 }
 0x124   :  { %2202 = vmatpush3.bf16.msra.mxu1 %v2529_v30  ;;  %2181 = vmatprep.subr.bf16.mxu0 %v2530_v31 }
 0x125   :  { %2203 = vmatprep.subr.bf16.mxu1 %v2531_v32 }
 0x127   :  { %2182 = vmatpush3.bf16.msra.mxu0 %v2532_v33 }
 0x128   :  { %2204 = vmatpush3.bf16.msra.mxu1 %v2533_v34  ;;  %2183 = vmatprep.subr.bf16.mxu0 %v2534_v35 }
 0x129   :  { %2205 = vmatprep.subr.bf16.mxu1 %v2535_v36 }
 0x12b   :  { %2184 = vmatpush3.bf16.msra.mxu0 %v2536_v37 }
 0x12c   :  { %2206 = vmatpush3.bf16.msra.mxu1 %v2537_v38 }
 0x12e   :  { %1847 = vmatmul.mubr.bf16.vlgmr.msra.gmra.mxu0 %v2853_v52 }
 0x12f   :  { %1887 = vmatmul.mubr.bf16.vlgmr.msra.gmra.mxu1 %v2855_v53 }
 0x14e   :  { %v1602_v42 = vpop.f32.mrf.mxu0  ;;  %v1643_v43 = vpop.f32.mrf.mxu1 }
 0x14f   :  { %v1603_v44 = vadd.f32 %v1602_v42, %v384_v40 }
 0x150   :  { %v1604_v45 = vpop.f32.mrf.mxu0  ;;  %v1645_v46 = vpop.f32.mrf.mxu1 }
 0x151   :  { %v1644_v47 = vadd.f32 %v1643_v43, %v1603_v44  ;;  %v1605_v52 = vadd.f32 %v1604_v45, %v388_v41 }
 0x152   :  { %v1606_v48 = vpop.f32.mrf.mxu0  ;;  %v1647_v53 = vpop.f32.mrf.mxu1 }
 0x153   :  { %v1894_v49 = vmul.f32 0.5, %v1644_v47  ;;  %v1646_v54 = vadd.f32 %v1645_v46, %v1605_v52  ;;  %v407_v46 = vsub.s32 6, %v2808_v6 }
 0x154   :  { %v1607_v55 = vpop.f32.mrf.mxu0  ;;  %v1648_v56 = vpop.f32.mrf.mxu1 }
 0x155   :  { %2538 = vtanh.f32 %v1894_v49  ;;  %v1895_v57 = vmul.f32 0.5, %v1646_v54  ;;  %v408_v48 = vrot.slane %v3344_v39, %v407_v46 }
 0x157   :  { %2540 = vtanh.f32 %v1895_v57 }
 0x162   :  { %v2539_v8 = vpop.eup %2538 }
 0x163   :  { %v1908_v58 = vadd.f32 1.0, %v2539_v8 }
 0x164   :  { %v2541_v59 = vpop.eup %2540 }
 0x165   :  { %v1915_v9 = vmul.f32 0.5, %v1908_v58  ;;  %v1909_v60 = vadd.f32 1.0, %v2541_v59 }
 0x167   :  { %1922 = vst [vmem:[#allocation2] sm:$0xff] %v1915_v9  ;;  %v1916_v61 = vmul.f32 0.5, %v1909_v60 }
 0x169   :  { %1923 = vst [vmem:[#allocation2 + $0x8] sm:$0xff] %v1916_v61 }
 0x18e   :  { %v1684_v0 = vpop.f32.mrf.mxu0  ;;  %v1725_v1 = vpop.f32.mrf.mxu1 }
 0x18f   :  { %v1685_v2 = vadd.f32 %v1684_v0, %v392_v62 }
 0x190   :  { %v1686_v3 = vpop.f32.mrf.mxu0  ;;  %v1727_v4 = vpop.f32.mrf.mxu1 }
 0x191   :  { %v1726_v5 = vadd.f32 %v1725_v1, %v1685_v2  ;;  %v1687_v7 = vadd.f32 %v1686_v3, %v396_v63 }
 0x192   :  { %v1688_v12 = vpop.f32.mrf.mxu0  ;;  %v1729_v13 = vpop.f32.mrf.mxu1 }
 0x193   :  { %v1896_v14 = vmul.f32 0.5, %v1726_v5  ;;  %v1728_v15 = vadd.f32 %v1727_v4, %v1687_v7 }
 0x194   :  { %v1689_v16 = vpop.f32.mrf.mxu0  ;;  %v1730_v17 = vpop.f32.mrf.mxu1 }
 0x195   :  { %2542 = vtanh.f32 %v1896_v14  ;;  %v1897_v18 = vmul.f32 0.5, %v1728_v15 }
 0x197   :  { %2544 = vtanh.f32 %v1897_v18 }
 0x1a2   :  { %v2543_v10 = vpop.eup %2542 }
 0x1a3   :  { %v1910_v50 = vadd.f32 1.0, %v2543_v10 }
 0x1a4   :  { %v2545_v19 = vpop.eup %2544 }
 0x1a5   :  { %v1917_v11 = vmul.f32 0.5, %v1910_v50  ;;  %v1911_v51 = vadd.f32 1.0, %v2545_v19 }
 0x1a7   :  { %1924 = vst [vmem:[#allocation2 + $0x10] sm:$0xff] %v1917_v11  ;;  %v1918_v20 = vmul.f32 0.5, %v1911_v51 }
 0x1a9   :  { %1925 = vst [vmem:[#allocation2 + $0x18] sm:$0xff] %v1918_v20 }
 0x1ce   :  { %v1766_v25 = vpop.f32.mrf.mxu0 }
 0x1cf   :  { %v1767_v26 = vadd.f32 %v1766_v25, %v400_v23  ;;  %v1807_v27 = vpop.f32.mrf.mxu1 }
 0x1d0   :  { %v1768_v28 = vpop.f32.mrf.mxu0 }
 0x1d1   :  { %v1808_v29 = vadd.f32 %v1807_v27, %v1767_v26  ;;  %v1769_v30 = vadd.f32 %v1768_v28, %v404_v24  ;;  %v1809_v31 = vpop.f32.mrf.mxu1 }
 0x1d2   :  { %v1770_v32 = vpop.f32.mrf.mxu0 }
 0x1d3   :  { %v1898_v33 = vmul.f32 0.5, %v1808_v29  ;;  %v1810_v34 = vadd.f32 %v1809_v31, %v1769_v30  ;;  %v1811_v35 = vpop.f32.mrf.mxu1 }
 0x1d4   :  { %v1771_v36 = vpop.f32.mrf.mxu0 }
 0x1d5   :  { %2546 = vtanh.f32 %v1898_v33  ;;  %v1899_v37 = vmul.f32 0.5, %v1810_v34  ;;  %v1812_v38 = vpop.f32.mrf.mxu1 }
 0x1d7   :  { %2548 = vtanh.f32 %v1899_v37 }
 0x1e2   :  { %v2547_v40 = vpop.eup %2546 }
 0x1e3   :  { %v1912_v41 = vadd.f32 1.0, %v2547_v40 }
 0x1e4   :  { %v2549_v42 = vpop.eup %2548 }
 0x1e5   :  { %v1919_v43 = vmul.f32 0.5, %v1912_v41  ;;  %v1913_v44 = vadd.f32 1.0, %v2549_v42 }
 0x1e7   :  { %1926 = vst [vmem:[#allocation2 + $0x20] sm:$0xff] %v1919_v43  ;;  %v1920_v45 = vmul.f32 0.5, %v1913_v44 }
 0x1e9   :  { %1927 = vst [vmem:[#allocation2 + $0x28] sm:$0xff] %v1920_v45 }
 0x1ee   :  { %v2185_v47 = vpop.f32.mrf.mxu0 }
 0x1ef   :  { %v2207_v52 = vpop.f32.mrf.mxu1 }
 0x1f0   :  { %v2186_v53 = vpop.f32.mrf.mxu0 }
 0x1f1   :  { %v2187_v49 = vadd.f32 %v2186_v53, %v2185_v47  ;;  %v2208_v54 = vpop.f32.mrf.mxu1 }
 0x1f2   :  { %v2188_v55 = vpop.f32.mrf.mxu0  ;;  %v2209_v57 = vadd.f32 %v2208_v54, %v2207_v52 }
 0x1f3   :  { %v1849_v56 = vadd.f32 %v2187_v49, %v408_v48  ;;  %v2210_v8 = vpop.f32.mrf.mxu1 }
 0x1f4   :  { %v2189_v58 = vpop.f32.mrf.mxu0 }
 0x1f5   :  { %v1889_v59 = vadd.f32 %v2209_v57, %v1849_v56  ;;  %v2211_v9 = vpop.f32.mrf.mxu1 }
 0x1f7   :  { %v1900_v60 = vmul.f32 0.5, %v1889_v59 }
 0x1f9   :  { %2550 = vtanh.f32 %v1900_v60 }
 0x206   :  { %v2551_v61 = vpop.eup %2550 }
 0x207   :  { %v1914_v6 = vadd.f32 1.0, %v2551_v61 }
 0x209   :  { %v1921_v62 = vmul.f32 0.5, %v1914_v6 }
 0x20b   :  { %1929 = vst.msk [vmem:[#allocation2 + $0x30] sm:$0xff] %vm1928_vm0, %v1921_v62 }
 0x20c   :  { %2563 = shalt.err (!%p2560_p4)
}
 0x20d   :  { %1939 = dma.vmem_to_hbm [thread:$0]  %s1937_s4, 896, %s3368_s5, [#allocation3]  }
 0x20e   :  { %2572 = dma.done.wait [#allocation3], 896  }
 0x20f   :  { %2573 = vsyncadd [#allocation3], 4294966400 }
 0x210   :  { %1943 = vsyncpa [#allocation3], 1 }

</bundles_post_ra>
